<compile_context>
chip_gen: v5e
topology: v5e:2x2
jax: 0.10.0
libtpu: 0.0.40
codegen_flags: <defaults>
</compile_context>

<pallas_src>
import numpy as np

import jax
import jax.numpy as jnp
from jax import lax
from jax.experimental import pallas as pl
from jax.experimental.pallas import tpu as pltpu


def _tap_masks(H, W):
    """0/1 validity mask per 3x3 tap over the flattened H*W axis (host const)."""
    pos = np.arange(H * W)
    row, col = pos // W, pos % W
    masks = np.ones((9, 1, H * W), np.float32)
    for k in range(9):
        dy, dx = k // 3 - 1, k % 3 - 1
        ok = np.ones(H * W, bool)
        if dy == -1:
            ok &= row >= 1
        elif dy == 1:
            ok &= row <= H - 2
        if dx == -1:
            ok &= col >= 1
        elif dx == 1:
            ok &= col <= W - 2
        masks[k, 0] = ok.astype(np.float32)
    return masks


def _make_fused_kernel(H, W):
    HW = H * W
    # Flat-index offset of each tap: (dy, dx) -> dy*W + dx, tap-major k = ky*3+kx.
    taps = tuple((k // 3 - 1) * W + (k % 3 - 1) for k in range(9))

    def kernel(x_ref, m_ref, w1_ref, w2_ref, s1_ref, b1_ref, s2_ref, b2_ref,
               o_ref):
        x = x_ref[0]          # (Cin, HW)   lane-dense: HW on the lane axis
        masks = m_ref[...]    # (9, 1, HW)  0/1 boundary masks, one per tap
        w1 = w1_ref[...]      # (9, Cmid, Cin)  tap-major weights (hoisted once)
        w2 = w2_ref[...]      # (9, Cout, Cmid)

        def conv3x3(inp, w):
            """SAME 3x3 conv on (C_in, HW) -> (C_out, HW), f32 accumulation."""
            acc = jnp.zeros((w.shape[1], HW), jnp.float32)
            for k, off in enumerate(taps):
                if off == 0:
                    shifted = inp
                else:
                    # shifted[:, p] = inp[:, p + off]; wrapped / out-of-image
                    # contributions are zeroed by the 0/1 mask.
                    shifted = jnp.roll(inp, -off, axis=1) * masks[k]
                acc = acc + jnp.dot(w[k], shifted,
                                    preferred_element_type=jnp.float32)
            return acc

        h = conv3x3(x, w1)                                    # conv1
        h = jnp.maximum(h * s1_ref[...] + b1_ref[...], 0.0)   # folded BN1 + ReLU
        y = conv3x3(h, w2)                                    # conv2 (VMEM-resident input)
        y = jnp.maximum(y * s2_ref[...] + b2_ref[...], 0.0)   # folded BN2 + ReLU
        o_ref[0] = y.astype(o_ref.dtype)                      # lane-dense store

    return kernel


def conv_block_nested_apply(x_nchw, params, eps=1e-5):
    """Fused ConvBlockNested forward. Input/output NCHW like PyTorch."""
    B, Cin, H, W = x_nchw.shape
    w1, w2 = params["conv1_w"], params["conv2_w"]
    Cmid, Cout = w1.shape[0], w2.shape[0]
    HW = H * W

    # Glue (tiny, fused by XLA): tap-major weights, folded BN scale/bias,
    # host-constant boundary masks, contiguous NCHW -> (B, C, H*W) reshape.
    w1p = jnp.transpose(w1, (2, 3, 0, 1)).reshape(9, Cmid, Cin)
    w2p = jnp.transpose(w2, (2, 3, 0, 1)).reshape(9, Cout, Cmid)

    def fold_bn(gamma, beta, mean, var):
        s = gamma / jnp.sqrt(var + eps)
        return s.reshape(-1, 1), (beta - mean * s).reshape(-1, 1)

    s1, b1 = fold_bn(params["bn1_gamma"], params["bn1_beta"],
                     params["bn1_mean"], params["bn1_var"])
    s2, b2 = fold_bn(params["bn2_gamma"], params["bn2_beta"],
                     params["bn2_mean"], params["bn2_var"])

    masks = jnp.asarray(_tap_masks(H, W))
    x_flat = x_nchw.reshape(B, Cin, HW)

    out_flat = pl.pallas_call(
        _make_fused_kernel(H, W),
        out_shape=jax.ShapeDtypeStruct((B, Cout, HW), jnp.float32),
        grid_spec=pltpu.PrefetchScalarGridSpec(
            num_scalar_prefetch=0,
            grid=(B,),
            in_specs=[
                pl.BlockSpec((1, Cin, HW), lambda b: (b, 0, 0)),
                pl.BlockSpec((9, 1, HW), lambda b: (0, 0, 0)),
                pl.BlockSpec((9, Cmid, Cin), lambda b: (0, 0, 0)),
                pl.BlockSpec((9, Cout, Cmid), lambda b: (0, 0, 0)),
                pl.BlockSpec((Cmid, 1), lambda b: (0, 0)),
                pl.BlockSpec((Cmid, 1), lambda b: (0, 0)),
                pl.BlockSpec((Cout, 1), lambda b: (0, 0)),
                pl.BlockSpec((Cout, 1), lambda b: (0, 0)),
            ],
            out_specs=pl.BlockSpec((1, Cout, HW), lambda b: (b, 0, 0)),
        ),
        compiler_params=pltpu.CompilerParams(
            dimension_semantics=("parallel",)),
    )(x_flat, masks, w1p, w2p, s1, b1, s2, b2)

    return out_flat.reshape(B, Cout, H, W)


@jax.jit
def conv_block_nested_forward(x_nchw, params):
    return conv_block_nested_apply(x_nchw, params)


def init_conv_block_nested_params(key, ch_in, ch_mid, ch_out, skip_in=0):
    """Deterministic synthetic parameters matching the PyTorch module shapes."""
    ch_in_eff = ch_in + skip_in
    keys = jax.random.split(key, 10)

    def conv_w(k, cout, cin):
        fan_in = cin * 9
        bound = 1.0 / jnp.sqrt(fan_in)
        return jax.random.uniform(k, (cout, cin, 3, 3), jnp.float32,
                                  -bound, bound)

    return {
        "conv1_w": conv_w(keys[0], ch_mid, ch_in_eff),
        "bn1_gamma": 1.0 + 0.1 * jax.random.normal(keys[1], (ch_mid,)),
        "bn1_beta": 0.1 * jax.random.normal(keys[2], (ch_mid,)),
        "bn1_mean": 0.1 * jax.random.normal(keys[3], (ch_mid,)),
        "bn1_var": jnp.abs(jax.random.normal(keys[4], (ch_mid,))) + 0.5,
        "conv2_w": conv_w(keys[5], ch_out, ch_mid),
        "bn2_gamma": 1.0 + 0.1 * jax.random.normal(keys[6], (ch_out,)),
        "bn2_beta": 0.1 * jax.random.normal(keys[7], (ch_out,)),
        "bn2_mean": 0.1 * jax.random.normal(keys[8], (ch_out,)),
        "bn2_var": jnp.abs(jax.random.normal(keys[9], (ch_out,))) + 0.5,
    }


def _reference_forward(x_nchw, params, eps=1e-5):
    """Pure-JAX reference (lax conv, NCHW) for correctness checking."""
    def stage(x, w, g, b, m, v):
        y = lax.conv_general_dilated(
            x, w, window_strides=(1, 1), padding="SAME",
            dimension_numbers=("NCHW", "OIHW", "NCHW"))
        inv = (1.0 / jnp.sqrt(v + eps))[None, :, None, None]
        y = (y - m[None, :, None, None]) * inv * g[None, :, None, None] \
            + b[None, :, None, None]
        return jnp.maximum(y, 0.0)

    x = stage(x_nchw, params["conv1_w"], params["bn1_gamma"],
              params["bn1_beta"], params["bn1_mean"], params["bn1_var"])
    x = stage(x, params["conv2_w"], params["bn2_gamma"], params["bn2_beta"],
              params["bn2_mean"], params["bn2_var"])
    return x


if __name__ == "__main__":
    key = jax.random.PRNGKey(0)
    k_x, k_p = jax.random.split(key)

    # ConvBlockNested(ch_in=4, ch_mid=8, ch_out=4, use_bn=True, skip_in=0)
    B, CH_IN, CH_MID, CH_OUT, H, W = 2, 4, 8, 4, 16, 16

    x = jax.random.normal(k_x, (B, CH_IN, H, W), jnp.float32)   # NCHW input
    params = init_conv_block_nested_params(k_p, CH_IN, CH_MID, CH_OUT)

    out = jax.block_until_ready(conv_block_nested_forward(x, params))
    ref = jax.block_until_ready(_reference_forward(x, params))

    assert out.shape == (B, CH_OUT, H, W), out.shape
    max_err = float(jnp.max(jnp.abs(out - ref)))
    assert jnp.allclose(out, ref, atol=1e-4, rtol=1e-4), max_err

    print("KERNEL_OK")
</pallas_src>

<mosaic_0001>
module attributes {stable_mosaic.version = 11 : i64} {
  func.func @kernel(%arg0: i32, %arg1: memref<1x4x256xf32, #tpu.memory_space<vmem>>, %arg2: memref<9x1x256xf32, #tpu.memory_space<vmem>>, %arg3: memref<9x8x4xf32, #tpu.memory_space<vmem>>, %arg4: memref<9x4x8xf32, #tpu.memory_space<vmem>>, %arg5: memref<8x1xf32, #tpu.memory_space<vmem>>, %arg6: memref<8x1xf32, #tpu.memory_space<vmem>>, %arg7: memref<4x1xf32, #tpu.memory_space<vmem>>, %arg8: memref<4x1xf32, #tpu.memory_space<vmem>>, %arg9: memref<1x4x256xf32, #tpu.memory_space<vmem>>) attributes {dimension_semantics = [#tpu.dimension_semantics<parallel>], iteration_bounds = array<i64: 2>, scalar_prefetch = 0 : i64, scratch_operands = 0 : i64, tpu.core_type = #tpu.core_type<tc>, window_params = [{transform_indices = @transform_0, window_bounds = array<i64: 1, 4, 256>}, {pipeline_mode = #tpu.pipeline_mode<synchronous>, transform_indices = @transform_1, window_bounds = array<i64: 9, 1, 256>}, {pipeline_mode = #tpu.pipeline_mode<synchronous>, transform_indices = @transform_2, window_bounds = array<i64: 9, 8, 4>}, {pipeline_mode = #tpu.pipeline_mode<synchronous>, transform_indices = @transform_3, window_bounds = array<i64: 9, 4, 8>}, {pipeline_mode = #tpu.pipeline_mode<synchronous>, transform_indices = @transform_4, window_bounds = array<i64: 8, 1>}, {pipeline_mode = #tpu.pipeline_mode<synchronous>, transform_indices = @transform_5, window_bounds = array<i64: 8, 1>}, {pipeline_mode = #tpu.pipeline_mode<synchronous>, transform_indices = @transform_6, window_bounds = array<i64: 4, 1>}, {pipeline_mode = #tpu.pipeline_mode<synchronous>, transform_indices = @transform_7, window_bounds = array<i64: 4, 1>}, {transform_indices = @transform_8, window_bounds = array<i64: 1, 4, 256>}]} {
    %c0 = arith.constant 0 : index
    %c0_0 = arith.constant 0 : index
    %c0_1 = arith.constant 0 : index
    %0 = vector.load %arg1[%c0, %c0_0, %c0_1] : memref<1x4x256xf32, #tpu.memory_space<vmem>>, vector<1x4x256xf32>
    %1 = vector.shape_cast %0 : vector<1x4x256xf32> to vector<4x256xf32>
    %c0_2 = arith.constant 0 : index
    %c0_3 = arith.constant 0 : index
    %c0_4 = arith.constant 0 : index
    %2 = vector.load %arg2[%c0_2, %c0_3, %c0_4] : memref<9x1x256xf32, #tpu.memory_space<vmem>>, vector<9x1x256xf32>
    %c0_5 = arith.constant 0 : index
    %c0_6 = arith.constant 0 : index
    %c0_7 = arith.constant 0 : index
    %3 = vector.load %arg3[%c0_5, %c0_6, %c0_7] : memref<9x8x4xf32, #tpu.memory_space<vmem>>, vector<9x8x4xf32>
    %c0_8 = arith.constant 0 : index
    %c0_9 = arith.constant 0 : index
    %c0_10 = arith.constant 0 : index
    %4 = vector.load %arg4[%c0_8, %c0_9, %c0_10] : memref<9x4x8xf32, #tpu.memory_space<vmem>>, vector<9x4x8xf32>
    %cst = arith.constant 0.000000e+00 : f32
    %5 = vector.broadcast %cst : f32 to vector<8x256xf32>
    %6 = vector.extract_strided_slice %1 {offsets = [0, 239], sizes = [4, 17], strides = [1, 1]} : vector<4x256xf32> to vector<4x17xf32>
    %7 = vector.extract_strided_slice %1 {offsets = [0, 0], sizes = [4, 239], strides = [1, 1]} : vector<4x256xf32> to vector<4x239xf32>
    %8 = tpu.concatenate %6, %7 in 1 : vector<4x17xf32>, vector<4x239xf32> -> vector<4x256xf32>
    %9 = vector.extract_strided_slice %2 {offsets = [0, 0, 0], sizes = [1, 1, 256], strides = [1, 1, 1]} : vector<9x1x256xf32> to vector<1x1x256xf32>
    %10 = vector.shape_cast %9 : vector<1x1x256xf32> to vector<1x256xf32>
    %11 = vector.broadcast %10 : vector<1x256xf32> to vector<4x256xf32>
    %12 = arith.mulf %8, %11 : vector<4x256xf32>
    %13 = vector.extract_strided_slice %3 {offsets = [0, 0, 0], sizes = [1, 8, 4], strides = [1, 1, 1]} : vector<9x8x4xf32> to vector<1x8x4xf32>
    %14 = vector.shape_cast %13 : vector<1x8x4xf32> to vector<8x4xf32>
    %cst_11 = arith.constant dense<0.000000e+00> : vector<8x256xf32>
    %15 = tpu.matmul %14, %12, %cst_11 {dimension_numbers = #tpu.dot_dimension_numbers<[1], [0], [0], [1], [0, 0, 1, 1], [], []>} : vector<8x4xf32>, vector<4x256xf32>, vector<8x256xf32> -> vector<8x256xf32>
    %16 = arith.addf %5, %15 : vector<8x256xf32>
    %17 = vector.extract_strided_slice %1 {offsets = [0, 240], sizes = [4, 16], strides = [1, 1]} : vector<4x256xf32> to vector<4x16xf32>
    %18 = vector.extract_strided_slice %1 {offsets = [0, 0], sizes = [4, 240], strides = [1, 1]} : vector<4x256xf32> to vector<4x240xf32>
    %19 = tpu.concatenate %17, %18 in 1 : vector<4x16xf32>, vector<4x240xf32> -> vector<4x256xf32>
    %20 = vector.extract_strided_slice %2 {offsets = [1, 0, 0], sizes = [1, 1, 256], strides = [1, 1, 1]} : vector<9x1x256xf32> to vector<1x1x256xf32>
    %21 = vector.shape_cast %20 : vector<1x1x256xf32> to vector<1x256xf32>
    %22 = vector.broadcast %21 : vector<1x256xf32> to vector<4x256xf32>
    %23 = arith.mulf %19, %22 : vector<4x256xf32>
    %24 = vector.extract_strided_slice %3 {offsets = [1, 0, 0], sizes = [1, 8, 4], strides = [1, 1, 1]} : vector<9x8x4xf32> to vector<1x8x4xf32>
    %25 = vector.shape_cast %24 : vector<1x8x4xf32> to vector<8x4xf32>
    %cst_12 = arith.constant dense<0.000000e+00> : vector<8x256xf32>
    %26 = tpu.matmul %25, %23, %cst_12 {dimension_numbers = #tpu.dot_dimension_numbers<[1], [0], [0], [1], [0, 0, 1, 1], [], []>} : vector<8x4xf32>, vector<4x256xf32>, vector<8x256xf32> -> vector<8x256xf32>
    %27 = arith.addf %16, %26 : vector<8x256xf32>
    %28 = vector.extract_strided_slice %1 {offsets = [0, 241], sizes = [4, 15], strides = [1, 1]} : vector<4x256xf32> to vector<4x15xf32>
    %29 = vector.extract_strided_slice %1 {offsets = [0, 0], sizes = [4, 241], strides = [1, 1]} : vector<4x256xf32> to vector<4x241xf32>
    %30 = tpu.concatenate %28, %29 in 1 : vector<4x15xf32>, vector<4x241xf32> -> vector<4x256xf32>
    %31 = vector.extract_strided_slice %2 {offsets = [2, 0, 0], sizes = [1, 1, 256], strides = [1, 1, 1]} : vector<9x1x256xf32> to vector<1x1x256xf32>
    %32 = vector.shape_cast %31 : vector<1x1x256xf32> to vector<1x256xf32>
    %33 = vector.broadcast %32 : vector<1x256xf32> to vector<4x256xf32>
    %34 = arith.mulf %30, %33 : vector<4x256xf32>
    %35 = vector.extract_strided_slice %3 {offsets = [2, 0, 0], sizes = [1, 8, 4], strides = [1, 1, 1]} : vector<9x8x4xf32> to vector<1x8x4xf32>
    %36 = vector.shape_cast %35 : vector<1x8x4xf32> to vector<8x4xf32>
    %cst_13 = arith.constant dense<0.000000e+00> : vector<8x256xf32>
    %37 = tpu.matmul %36, %34, %cst_13 {dimension_numbers = #tpu.dot_dimension_numbers<[1], [0], [0], [1], [0, 0, 1, 1], [], []>} : vector<8x4xf32>, vector<4x256xf32>, vector<8x256xf32> -> vector<8x256xf32>
    %38 = arith.addf %27, %37 : vector<8x256xf32>
    %39 = vector.extract_strided_slice %1 {offsets = [0, 255], sizes = [4, 1], strides = [1, 1]} : vector<4x256xf32> to vector<4x1xf32>
    %40 = vector.extract_strided_slice %1 {offsets = [0, 0], sizes = [4, 255], strides = [1, 1]} : vector<4x256xf32> to vector<4x255xf32>
    %41 = tpu.concatenate %39, %40 in 1 : vector<4x1xf32>, vector<4x255xf32> -> vector<4x256xf32>
    %42 = vector.extract_strided_slice %2 {offsets = [3, 0, 0], sizes = [1, 1, 256], strides = [1, 1, 1]} : vector<9x1x256xf32> to vector<1x1x256xf32>
    %43 = vector.shape_cast %42 : vector<1x1x256xf32> to vector<1x256xf32>
    %44 = vector.broadcast %43 : vector<1x256xf32> to vector<4x256xf32>
    %45 = arith.mulf %41, %44 : vector<4x256xf32>
    %46 = vector.extract_strided_slice %3 {offsets = [3, 0, 0], sizes = [1, 8, 4], strides = [1, 1, 1]} : vector<9x8x4xf32> to vector<1x8x4xf32>
    %47 = vector.shape_cast %46 : vector<1x8x4xf32> to vector<8x4xf32>
    %cst_14 = arith.constant dense<0.000000e+00> : vector<8x256xf32>
    %48 = tpu.matmul %47, %45, %cst_14 {dimension_numbers = #tpu.dot_dimension_numbers<[1], [0], [0], [1], [0, 0, 1, 1], [], []>} : vector<8x4xf32>, vector<4x256xf32>, vector<8x256xf32> -> vector<8x256xf32>
    %49 = arith.addf %38, %48 : vector<8x256xf32>
    %50 = vector.extract_strided_slice %3 {offsets = [4, 0, 0], sizes = [1, 8, 4], strides = [1, 1, 1]} : vector<9x8x4xf32> to vector<1x8x4xf32>
    %51 = vector.shape_cast %50 : vector<1x8x4xf32> to vector<8x4xf32>
    %cst_15 = arith.constant dense<0.000000e+00> : vector<8x256xf32>
    %52 = tpu.matmul %51, %1, %cst_15 {dimension_numbers = #tpu.dot_dimension_numbers<[1], [0], [0], [1], [0, 0, 1, 1], [], []>} : vector<8x4xf32>, vector<4x256xf32>, vector<8x256xf32> -> vector<8x256xf32>
    %53 = arith.addf %49, %52 : vector<8x256xf32>
    %54 = vector.extract_strided_slice %1 {offsets = [0, 1], sizes = [4, 255], strides = [1, 1]} : vector<4x256xf32> to vector<4x255xf32>
    %55 = vector.extract_strided_slice %1 {offsets = [0, 0], sizes = [4, 1], strides = [1, 1]} : vector<4x256xf32> to vector<4x1xf32>
    %56 = tpu.concatenate %54, %55 in 1 : vector<4x255xf32>, vector<4x1xf32> -> vector<4x256xf32>
    %57 = vector.extract_strided_slice %2 {offsets = [5, 0, 0], sizes = [1, 1, 256], strides = [1, 1, 1]} : vector<9x1x256xf32> to vector<1x1x256xf32>
    %58 = vector.shape_cast %57 : vector<1x1x256xf32> to vector<1x256xf32>
    %59 = vector.broadcast %58 : vector<1x256xf32> to vector<4x256xf32>
    %60 = arith.mulf %56, %59 : vector<4x256xf32>
    %61 = vector.extract_strided_slice %3 {offsets = [5, 0, 0], sizes = [1, 8, 4], strides = [1, 1, 1]} : vector<9x8x4xf32> to vector<1x8x4xf32>
    %62 = vector.shape_cast %61 : vector<1x8x4xf32> to vector<8x4xf32>
    %cst_16 = arith.constant dense<0.000000e+00> : vector<8x256xf32>
    %63 = tpu.matmul %62, %60, %cst_16 {dimension_numbers = #tpu.dot_dimension_numbers<[1], [0], [0], [1], [0, 0, 1, 1], [], []>} : vector<8x4xf32>, vector<4x256xf32>, vector<8x256xf32> -> vector<8x256xf32>
    %64 = arith.addf %53, %63 : vector<8x256xf32>
    %65 = vector.extract_strided_slice %1 {offsets = [0, 15], sizes = [4, 241], strides = [1, 1]} : vector<4x256xf32> to vector<4x241xf32>
    %66 = vector.extract_strided_slice %1 {offsets = [0, 0], sizes = [4, 15], strides = [1, 1]} : vector<4x256xf32> to vector<4x15xf32>
    %67 = tpu.concatenate %65, %66 in 1 : vector<4x241xf32>, vector<4x15xf32> -> vector<4x256xf32>
    %68 = vector.extract_strided_slice %2 {offsets = [6, 0, 0], sizes = [1, 1, 256], strides = [1, 1, 1]} : vector<9x1x256xf32> to vector<1x1x256xf32>
    %69 = vector.shape_cast %68 : vector<1x1x256xf32> to vector<1x256xf32>
    %70 = vector.broadcast %69 : vector<1x256xf32> to vector<4x256xf32>
    %71 = arith.mulf %67, %70 : vector<4x256xf32>
    %72 = vector.extract_strided_slice %3 {offsets = [6, 0, 0], sizes = [1, 8, 4], strides = [1, 1, 1]} : vector<9x8x4xf32> to vector<1x8x4xf32>
    %73 = vector.shape_cast %72 : vector<1x8x4xf32> to vector<8x4xf32>
    %cst_17 = arith.constant dense<0.000000e+00> : vector<8x256xf32>
    %74 = tpu.matmul %73, %71, %cst_17 {dimension_numbers = #tpu.dot_dimension_numbers<[1], [0], [0], [1], [0, 0, 1, 1], [], []>} : vector<8x4xf32>, vector<4x256xf32>, vector<8x256xf32> -> vector<8x256xf32>
    %75 = arith.addf %64, %74 : vector<8x256xf32>
    %76 = vector.extract_strided_slice %1 {offsets = [0, 16], sizes = [4, 240], strides = [1, 1]} : vector<4x256xf32> to vector<4x240xf32>
    %77 = vector.extract_strided_slice %1 {offsets = [0, 0], sizes = [4, 16], strides = [1, 1]} : vector<4x256xf32> to vector<4x16xf32>
    %78 = tpu.concatenate %76, %77 in 1 : vector<4x240xf32>, vector<4x16xf32> -> vector<4x256xf32>
    %79 = vector.extract_strided_slice %2 {offsets = [7, 0, 0], sizes = [1, 1, 256], strides = [1, 1, 1]} : vector<9x1x256xf32> to vector<1x1x256xf32>
    %80 = vector.shape_cast %79 : vector<1x1x256xf32> to vector<1x256xf32>
    %81 = vector.broadcast %80 : vector<1x256xf32> to vector<4x256xf32>
    %82 = arith.mulf %78, %81 : vector<4x256xf32>
    %83 = vector.extract_strided_slice %3 {offsets = [7, 0, 0], sizes = [1, 8, 4], strides = [1, 1, 1]} : vector<9x8x4xf32> to vector<1x8x4xf32>
    %84 = vector.shape_cast %83 : vector<1x8x4xf32> to vector<8x4xf32>
    %cst_18 = arith.constant dense<0.000000e+00> : vector<8x256xf32>
    %85 = tpu.matmul %84, %82, %cst_18 {dimension_numbers = #tpu.dot_dimension_numbers<[1], [0], [0], [1], [0, 0, 1, 1], [], []>} : vector<8x4xf32>, vector<4x256xf32>, vector<8x256xf32> -> vector<8x256xf32>
    %86 = arith.addf %75, %85 : vector<8x256xf32>
    %87 = vector.extract_strided_slice %1 {offsets = [0, 17], sizes = [4, 239], strides = [1, 1]} : vector<4x256xf32> to vector<4x239xf32>
    %88 = vector.extract_strided_slice %1 {offsets = [0, 0], sizes = [4, 17], strides = [1, 1]} : vector<4x256xf32> to vector<4x17xf32>
    %89 = tpu.concatenate %87, %88 in 1 : vector<4x239xf32>, vector<4x17xf32> -> vector<4x256xf32>
    %90 = vector.extract_strided_slice %2 {offsets = [8, 0, 0], sizes = [1, 1, 256], strides = [1, 1, 1]} : vector<9x1x256xf32> to vector<1x1x256xf32>
    %91 = vector.shape_cast %90 : vector<1x1x256xf32> to vector<1x256xf32>
    %92 = vector.broadcast %91 : vector<1x256xf32> to vector<4x256xf32>
    %93 = arith.mulf %89, %92 : vector<4x256xf32>
    %94 = vector.extract_strided_slice %3 {offsets = [8, 0, 0], sizes = [1, 8, 4], strides = [1, 1, 1]} : vector<9x8x4xf32> to vector<1x8x4xf32>
    %95 = vector.shape_cast %94 : vector<1x8x4xf32> to vector<8x4xf32>
    %cst_19 = arith.constant dense<0.000000e+00> : vector<8x256xf32>
    %96 = tpu.matmul %95, %93, %cst_19 {dimension_numbers = #tpu.dot_dimension_numbers<[1], [0], [0], [1], [0, 0, 1, 1], [], []>} : vector<8x4xf32>, vector<4x256xf32>, vector<8x256xf32> -> vector<8x256xf32>
    %97 = arith.addf %86, %96 : vector<8x256xf32>
    %c0_20 = arith.constant 0 : index
    %c0_21 = arith.constant 0 : index
    %98 = vector.load %arg5[%c0_20, %c0_21] : memref<8x1xf32, #tpu.memory_space<vmem>>, vector<8x1xf32>
    %99 = vector.broadcast %98 : vector<8x1xf32> to vector<8x256xf32>
    %100 = arith.mulf %97, %99 : vector<8x256xf32>
    %c0_22 = arith.constant 0 : index
    %c0_23 = arith.constant 0 : index
    %101 = vector.load %arg6[%c0_22, %c0_23] : memref<8x1xf32, #tpu.memory_space<vmem>>, vector<8x1xf32>
    %102 = vector.broadcast %101 : vector<8x1xf32> to vector<8x256xf32>
    %103 = arith.addf %100, %102 : vector<8x256xf32>
    %cst_24 = arith.constant 0.000000e+00 : f32
    %104 = vector.broadcast %cst_24 : f32 to vector<8x256xf32>
    %105 = arith.maximumf %103, %104 : vector<8x256xf32>
    %cst_25 = arith.constant 0.000000e+00 : f32
    %106 = vector.broadcast %cst_25 : f32 to vector<4x256xf32>
    %107 = vector.extract_strided_slice %105 {offsets = [0, 239], sizes = [8, 17], strides = [1, 1]} : vector<8x256xf32> to vector<8x17xf32>
    %108 = vector.extract_strided_slice %105 {offsets = [0, 0], sizes = [8, 239], strides = [1, 1]} : vector<8x256xf32> to vector<8x239xf32>
    %109 = tpu.concatenate %107, %108 in 1 : vector<8x17xf32>, vector<8x239xf32> -> vector<8x256xf32>
    %110 = vector.extract_strided_slice %2 {offsets = [0, 0, 0], sizes = [1, 1, 256], strides = [1, 1, 1]} : vector<9x1x256xf32> to vector<1x1x256xf32>
    %111 = vector.shape_cast %110 : vector<1x1x256xf32> to vector<1x256xf32>
    %112 = vector.broadcast %111 : vector<1x256xf32> to vector<8x256xf32>
    %113 = arith.mulf %109, %112 : vector<8x256xf32>
    %114 = vector.extract_strided_slice %4 {offsets = [0, 0, 0], sizes = [1, 4, 8], strides = [1, 1, 1]} : vector<9x4x8xf32> to vector<1x4x8xf32>
    %115 = vector.shape_cast %114 : vector<1x4x8xf32> to vector<4x8xf32>
    %cst_26 = arith.constant dense<0.000000e+00> : vector<4x256xf32>
    %116 = tpu.matmul %115, %113, %cst_26 {dimension_numbers = #tpu.dot_dimension_numbers<[1], [0], [0], [1], [0, 0, 1, 1], [], []>} : vector<4x8xf32>, vector<8x256xf32>, vector<4x256xf32> -> vector<4x256xf32>
    %117 = arith.addf %106, %116 : vector<4x256xf32>
    %118 = vector.extract_strided_slice %105 {offsets = [0, 240], sizes = [8, 16], strides = [1, 1]} : vector<8x256xf32> to vector<8x16xf32>
    %119 = vector.extract_strided_slice %105 {offsets = [0, 0], sizes = [8, 240], strides = [1, 1]} : vector<8x256xf32> to vector<8x240xf32>
    %120 = tpu.concatenate %118, %119 in 1 : vector<8x16xf32>, vector<8x240xf32> -> vector<8x256xf32>
    %121 = vector.extract_strided_slice %2 {offsets = [1, 0, 0], sizes = [1, 1, 256], strides = [1, 1, 1]} : vector<9x1x256xf32> to vector<1x1x256xf32>
    %122 = vector.shape_cast %121 : vector<1x1x256xf32> to vector<1x256xf32>
    %123 = vector.broadcast %122 : vector<1x256xf32> to vector<8x256xf32>
    %124 = arith.mulf %120, %123 : vector<8x256xf32>
    %125 = vector.extract_strided_slice %4 {offsets = [1, 0, 0], sizes = [1, 4, 8], strides = [1, 1, 1]} : vector<9x4x8xf32> to vector<1x4x8xf32>
    %126 = vector.shape_cast %125 : vector<1x4x8xf32> to vector<4x8xf32>
    %cst_27 = arith.constant dense<0.000000e+00> : vector<4x256xf32>
    %127 = tpu.matmul %126, %124, %cst_27 {dimension_numbers = #tpu.dot_dimension_numbers<[1], [0], [0], [1], [0, 0, 1, 1], [], []>} : vector<4x8xf32>, vector<8x256xf32>, vector<4x256xf32> -> vector<4x256xf32>
    %128 = arith.addf %117, %127 : vector<4x256xf32>
    %129 = vector.extract_strided_slice %105 {offsets = [0, 241], sizes = [8, 15], strides = [1, 1]} : vector<8x256xf32> to vector<8x15xf32>
    %130 = vector.extract_strided_slice %105 {offsets = [0, 0], sizes = [8, 241], strides = [1, 1]} : vector<8x256xf32> to vector<8x241xf32>
    %131 = tpu.concatenate %129, %130 in 1 : vector<8x15xf32>, vector<8x241xf32> -> vector<8x256xf32>
    %132 = vector.extract_strided_slice %2 {offsets = [2, 0, 0], sizes = [1, 1, 256], strides = [1, 1, 1]} : vector<9x1x256xf32> to vector<1x1x256xf32>
    %133 = vector.shape_cast %132 : vector<1x1x256xf32> to vector<1x256xf32>
    %134 = vector.broadcast %133 : vector<1x256xf32> to vector<8x256xf32>
    %135 = arith.mulf %131, %134 : vector<8x256xf32>
    %136 = vector.extract_strided_slice %4 {offsets = [2, 0, 0], sizes = [1, 4, 8], strides = [1, 1, 1]} : vector<9x4x8xf32> to vector<1x4x8xf32>
    %137 = vector.shape_cast %136 : vector<1x4x8xf32> to vector<4x8xf32>
    %cst_28 = arith.constant dense<0.000000e+00> : vector<4x256xf32>
    %138 = tpu.matmul %137, %135, %cst_28 {dimension_numbers = #tpu.dot_dimension_numbers<[1], [0], [0], [1], [0, 0, 1, 1], [], []>} : vector<4x8xf32>, vector<8x256xf32>, vector<4x256xf32> -> vector<4x256xf32>
    %139 = arith.addf %128, %138 : vector<4x256xf32>
    %140 = vector.extract_strided_slice %105 {offsets = [0, 255], sizes = [8, 1], strides = [1, 1]} : vector<8x256xf32> to vector<8x1xf32>
    %141 = vector.extract_strided_slice %105 {offsets = [0, 0], sizes = [8, 255], strides = [1, 1]} : vector<8x256xf32> to vector<8x255xf32>
    %142 = tpu.concatenate %140, %141 in 1 : vector<8x1xf32>, vector<8x255xf32> -> vector<8x256xf32>
    %143 = vector.extract_strided_slice %2 {offsets = [3, 0, 0], sizes = [1, 1, 256], strides = [1, 1, 1]} : vector<9x1x256xf32> to vector<1x1x256xf32>
    %144 = vector.shape_cast %143 : vector<1x1x256xf32> to vector<1x256xf32>
    %145 = vector.broadcast %144 : vector<1x256xf32> to vector<8x256xf32>
    %146 = arith.mulf %142, %145 : vector<8x256xf32>
    %147 = vector.extract_strided_slice %4 {offsets = [3, 0, 0], sizes = [1, 4, 8], strides = [1, 1, 1]} : vector<9x4x8xf32> to vector<1x4x8xf32>
    %148 = vector.shape_cast %147 : vector<1x4x8xf32> to vector<4x8xf32>
    %cst_29 = arith.constant dense<0.000000e+00> : vector<4x256xf32>
    %149 = tpu.matmul %148, %146, %cst_29 {dimension_numbers = #tpu.dot_dimension_numbers<[1], [0], [0], [1], [0, 0, 1, 1], [], []>} : vector<4x8xf32>, vector<8x256xf32>, vector<4x256xf32> -> vector<4x256xf32>
    %150 = arith.addf %139, %149 : vector<4x256xf32>
    %151 = vector.extract_strided_slice %4 {offsets = [4, 0, 0], sizes = [1, 4, 8], strides = [1, 1, 1]} : vector<9x4x8xf32> to vector<1x4x8xf32>
    %152 = vector.shape_cast %151 : vector<1x4x8xf32> to vector<4x8xf32>
    %cst_30 = arith.constant dense<0.000000e+00> : vector<4x256xf32>
    %153 = tpu.matmul %152, %105, %cst_30 {dimension_numbers = #tpu.dot_dimension_numbers<[1], [0], [0], [1], [0, 0, 1, 1], [], []>} : vector<4x8xf32>, vector<8x256xf32>, vector<4x256xf32> -> vector<4x256xf32>
    %154 = arith.addf %150, %153 : vector<4x256xf32>
    %155 = vector.extract_strided_slice %105 {offsets = [0, 1], sizes = [8, 255], strides = [1, 1]} : vector<8x256xf32> to vector<8x255xf32>
    %156 = vector.extract_strided_slice %105 {offsets = [0, 0], sizes = [8, 1], strides = [1, 1]} : vector<8x256xf32> to vector<8x1xf32>
    %157 = tpu.concatenate %155, %156 in 1 : vector<8x255xf32>, vector<8x1xf32> -> vector<8x256xf32>
    %158 = vector.extract_strided_slice %2 {offsets = [5, 0, 0], sizes = [1, 1, 256], strides = [1, 1, 1]} : vector<9x1x256xf32> to vector<1x1x256xf32>
    %159 = vector.shape_cast %158 : vector<1x1x256xf32> to vector<1x256xf32>
    %160 = vector.broadcast %159 : vector<1x256xf32> to vector<8x256xf32>
    %161 = arith.mulf %157, %160 : vector<8x256xf32>
    %162 = vector.extract_strided_slice %4 {offsets = [5, 0, 0], sizes = [1, 4, 8], strides = [1, 1, 1]} : vector<9x4x8xf32> to vector<1x4x8xf32>
    %163 = vector.shape_cast %162 : vector<1x4x8xf32> to vector<4x8xf32>
    %cst_31 = arith.constant dense<0.000000e+00> : vector<4x256xf32>
    %164 = tpu.matmul %163, %161, %cst_31 {dimension_numbers = #tpu.dot_dimension_numbers<[1], [0], [0], [1], [0, 0, 1, 1], [], []>} : vector<4x8xf32>, vector<8x256xf32>, vector<4x256xf32> -> vector<4x256xf32>
    %165 = arith.addf %154, %164 : vector<4x256xf32>
    %166 = vector.extract_strided_slice %105 {offsets = [0, 15], sizes = [8, 241], strides = [1, 1]} : vector<8x256xf32> to vector<8x241xf32>
    %167 = vector.extract_strided_slice %105 {offsets = [0, 0], sizes = [8, 15], strides = [1, 1]} : vector<8x256xf32> to vector<8x15xf32>
    %168 = tpu.concatenate %166, %167 in 1 : vector<8x241xf32>, vector<8x15xf32> -> vector<8x256xf32>
    %169 = vector.extract_strided_slice %2 {offsets = [6, 0, 0], sizes = [1, 1, 256], strides = [1, 1, 1]} : vector<9x1x256xf32> to vector<1x1x256xf32>
    %170 = vector.shape_cast %169 : vector<1x1x256xf32> to vector<1x256xf32>
    %171 = vector.broadcast %170 : vector<1x256xf32> to vector<8x256xf32>
    %172 = arith.mulf %168, %171 : vector<8x256xf32>
    %173 = vector.extract_strided_slice %4 {offsets = [6, 0, 0], sizes = [1, 4, 8], strides = [1, 1, 1]} : vector<9x4x8xf32> to vector<1x4x8xf32>
    %174 = vector.shape_cast %173 : vector<1x4x8xf32> to vector<4x8xf32>
    %cst_32 = arith.constant dense<0.000000e+00> : vector<4x256xf32>
    %175 = tpu.matmul %174, %172, %cst_32 {dimension_numbers = #tpu.dot_dimension_numbers<[1], [0], [0], [1], [0, 0, 1, 1], [], []>} : vector<4x8xf32>, vector<8x256xf32>, vector<4x256xf32> -> vector<4x256xf32>
    %176 = arith.addf %165, %175 : vector<4x256xf32>
    %177 = vector.extract_strided_slice %105 {offsets = [0, 16], sizes = [8, 240], strides = [1, 1]} : vector<8x256xf32> to vector<8x240xf32>
    %178 = vector.extract_strided_slice %105 {offsets = [0, 0], sizes = [8, 16], strides = [1, 1]} : vector<8x256xf32> to vector<8x16xf32>
    %179 = tpu.concatenate %177, %178 in 1 : vector<8x240xf32>, vector<8x16xf32> -> vector<8x256xf32>
    %180 = vector.extract_strided_slice %2 {offsets = [7, 0, 0], sizes = [1, 1, 256], strides = [1, 1, 1]} : vector<9x1x256xf32> to vector<1x1x256xf32>
    %181 = vector.shape_cast %180 : vector<1x1x256xf32> to vector<1x256xf32>
    %182 = vector.broadcast %181 : vector<1x256xf32> to vector<8x256xf32>
    %183 = arith.mulf %179, %182 : vector<8x256xf32>
    %184 = vector.extract_strided_slice %4 {offsets = [7, 0, 0], sizes = [1, 4, 8], strides = [1, 1, 1]} : vector<9x4x8xf32> to vector<1x4x8xf32>
    %185 = vector.shape_cast %184 : vector<1x4x8xf32> to vector<4x8xf32>
    %cst_33 = arith.constant dense<0.000000e+00> : vector<4x256xf32>
    %186 = tpu.matmul %185, %183, %cst_33 {dimension_numbers = #tpu.dot_dimension_numbers<[1], [0], [0], [1], [0, 0, 1, 1], [], []>} : vector<4x8xf32>, vector<8x256xf32>, vector<4x256xf32> -> vector<4x256xf32>
    %187 = arith.addf %176, %186 : vector<4x256xf32>
    %188 = vector.extract_strided_slice %105 {offsets = [0, 17], sizes = [8, 239], strides = [1, 1]} : vector<8x256xf32> to vector<8x239xf32>
    %189 = vector.extract_strided_slice %105 {offsets = [0, 0], sizes = [8, 17], strides = [1, 1]} : vector<8x256xf32> to vector<8x17xf32>
    %190 = tpu.concatenate %188, %189 in 1 : vector<8x239xf32>, vector<8x17xf32> -> vector<8x256xf32>
    %191 = vector.extract_strided_slice %2 {offsets = [8, 0, 0], sizes = [1, 1, 256], strides = [1, 1, 1]} : vector<9x1x256xf32> to vector<1x1x256xf32>
    %192 = vector.shape_cast %191 : vector<1x1x256xf32> to vector<1x256xf32>
    %193 = vector.broadcast %192 : vector<1x256xf32> to vector<8x256xf32>
    %194 = arith.mulf %190, %193 : vector<8x256xf32>
    %195 = vector.extract_strided_slice %4 {offsets = [8, 0, 0], sizes = [1, 4, 8], strides = [1, 1, 1]} : vector<9x4x8xf32> to vector<1x4x8xf32>
    %196 = vector.shape_cast %195 : vector<1x4x8xf32> to vector<4x8xf32>
    %cst_34 = arith.constant dense<0.000000e+00> : vector<4x256xf32>
    %197 = tpu.matmul %196, %194, %cst_34 {dimension_numbers = #tpu.dot_dimension_numbers<[1], [0], [0], [1], [0, 0, 1, 1], [], []>} : vector<4x8xf32>, vector<8x256xf32>, vector<4x256xf32> -> vector<4x256xf32>
    %198 = arith.addf %187, %197 : vector<4x256xf32>
    %c0_35 = arith.constant 0 : index
    %c0_36 = arith.constant 0 : index
    %199 = vector.load %arg7[%c0_35, %c0_36] : memref<4x1xf32, #tpu.memory_space<vmem>>, vector<4x1xf32>
    %200 = vector.broadcast %199 : vector<4x1xf32> to vector<4x256xf32>
    %201 = arith.mulf %198, %200 : vector<4x256xf32>
    %c0_37 = arith.constant 0 : index
    %c0_38 = arith.constant 0 : index
    %202 = vector.load %arg8[%c0_37, %c0_38] : memref<4x1xf32, #tpu.memory_space<vmem>>, vector<4x1xf32>
    %203 = vector.broadcast %202 : vector<4x1xf32> to vector<4x256xf32>
    %204 = arith.addf %201, %203 : vector<4x256xf32>
    %cst_39 = arith.constant 0.000000e+00 : f32
    %205 = vector.broadcast %cst_39 : f32 to vector<4x256xf32>
    %206 = arith.maximumf %204, %205 : vector<4x256xf32>
    %c0_40 = arith.constant 0 : index
    %c0_41 = arith.constant 0 : index
    %c0_42 = arith.constant 0 : index
    %207 = vector.load %arg9[%c0_40, %c0_41, %c0_42] : memref<1x4x256xf32, #tpu.memory_space<vmem>>, vector<1x4x256xf32>
    %208 = vector.shape_cast %207 : vector<1x4x256xf32> to vector<4x256xf32>
    %209 = vector.shape_cast %206 : vector<4x256xf32> to vector<1x4x256xf32>
    tpu.vector_store %arg9[%c0_40, %c0_41, %c0_42], %209 {strides = array<i32>} : memref<1x4x256xf32, #tpu.memory_space<vmem>>, vector<1x4x256xf32>,
    return
  }
  func.func @transform_0(%arg0: i32) -> (i32, i32, i32) {
    %c0_i32 = arith.constant 0 : i32
    %c0_i32_0 = arith.constant 0 : i32
    %c0_i32_1 = arith.constant 0 : i32
    return %arg0, %c0_i32, %c0_i32_0 : i32, i32, i32
  }
  func.func @transform_1(%arg0: i32) -> (i32, i32, i32) {
    %c0_i32 = arith.constant 0 : i32
    %c0_i32_0 = arith.constant 0 : i32
    %c0_i32_1 = arith.constant 0 : i32
    %c0_i32_2 = arith.constant 0 : i32
    return %c0_i32, %c0_i32_0, %c0_i32_1 : i32, i32, i32
  }
  func.func @transform_2(%arg0: i32) -> (i32, i32, i32) {
    %c0_i32 = arith.constant 0 : i32
    %c0_i32_0 = arith.constant 0 : i32
    %c0_i32_1 = arith.constant 0 : i32
    %c0_i32_2 = arith.constant 0 : i32
    return %c0_i32, %c0_i32_0, %c0_i32_1 : i32, i32, i32
  }
  func.func @transform_3(%arg0: i32) -> (i32, i32, i32) {
    %c0_i32 = arith.constant 0 : i32
    %c0_i32_0 = arith.constant 0 : i32
    %c0_i32_1 = arith.constant 0 : i32
    %c0_i32_2 = arith.constant 0 : i32
    return %c0_i32, %c0_i32_0, %c0_i32_1 : i32, i32, i32
  }
  func.func @transform_4(%arg0: i32) -> (i32, i32) {
    %c0_i32 = arith.constant 0 : i32
    %c0_i32_0 = arith.constant 0 : i32
    %c0_i32_1 = arith.constant 0 : i32
    return %c0_i32, %c0_i32_0 : i32, i32
  }
  func.func @transform_5(%arg0: i32) -> (i32, i32) {
    %c0_i32 = arith.constant 0 : i32
    %c0_i32_0 = arith.constant 0 : i32
    %c0_i32_1 = arith.constant 0 : i32
    return %c0_i32, %c0_i32_0 : i32, i32
  }
  func.func @transform_6(%arg0: i32) -> (i32, i32) {
    %c0_i32 = arith.constant 0 : i32
    %c0_i32_0 = arith.constant 0 : i32
    %c0_i32_1 = arith.constant 0 : i32
    return %c0_i32, %c0_i32_0 : i32, i32
  }
  func.func @transform_7(%arg0: i32) -> (i32, i32) {
    %c0_i32 = arith.constant 0 : i32
    %c0_i32_0 = arith.constant 0 : i32
    %c0_i32_1 = arith.constant 0 : i32
    return %c0_i32, %c0_i32_0 : i32, i32
  }
  func.func @transform_8(%arg0: i32) -> (i32, i32, i32) {
    %c0_i32 = arith.constant 0 : i32
    %c0_i32_0 = arith.constant 0 : i32
    %c0_i32_1 = arith.constant 0 : i32
    return %arg0, %c0_i32, %c0_i32_0 : i32, i32, i32
  }
}

</mosaic_0001>

<bundles_post_ra>
// kernel: conv_block_nested_forward.1
= control target key start
LH: loop header
LB: loop body
LE: loop exit
PB: predicated region body
PF: predicated region fallthrough
CT: control target
= control target key end

     0   :  { %s1722_s27 = smov 0   ;;  %s2084_s0 = inlined_call_operand.vmem [shape: f32[2,4,256], index: 0, kind: input, shape index: {}]   ;;  %s2085_s1 = inlined_call_operand.vmem [shape: f32[9,1,256], index: 1, kind: input, shape index: {}]   ;;  %s2086_s2 = inlined_call_operand.vmem [shape: f32[9,8,4], index: 2, kind: input, shape index: {}]   ;;  %s2087_s3 = inlined_call_operand.vmem [shape: f32[9,4,8], index: 3, kind: input, shape index: {}]   ;;  %s2088_s4 = inlined_call_operand.vmem [shape: f32[8,1], index: 4, kind: input, shape index: {}]   ;;  %s2089_s5 = inlined_call_operand.vmem [shape: f32[8,1], index: 5, kind: input, shape index: {}]   ;;  %s2090_s6 = inlined_call_operand.vmem [shape: f32[4,1], index: 6, kind: input, shape index: {}]   ;;  %s2091_s7 = inlined_call_operand.vmem [shape: f32[4,1], index: 7, kind: input, shape index: {}]   ;;  %s2092_s8 = inlined_call_operand.vmem [shape: f32[2,4,256], index: 8, kind: output, shape index: {}]  }
   0x1 LB: > { %s1573_s28 = sadd.s32 4294967295, %s1666_s27   ;;  %p1577_p0 = scmp.ge.s32.totalorder %s1666_s27, 1  ;;  %s1666_s27 = sphi %s1722_s27, %s18_s27  }
   0x2   : > { %p262_p1 = scmp.lt.s32.totalorder %s1666_s27, 3 }
   0x4   : > { %p263_p2 = pnand %p1577_p0, %p262_p1 }
   0x5   : > { %p296_p3 = scmp.lt.s32.totalorder (!%p263_p2), %s1573_s28, 1  ;;  %s1668_s11 = smov (!%p263_p2), 17  }
   0x6   : > { %266 = sbr.rel (%p263_p2) target bundleno = 693 (0x2b5), region = 52  ;;  %s1669_s12 = smov (!%p263_p2), 16  }
   0x7   : > { %s1670_s13 = smov (!%p263_p2), 15   ;;  %s1671_s14 = smov (!%p263_p2), 1  }
   0x8   : > { %s1672_s15 = smov (!%p263_p2), 127   ;;  %s1673_s16 = smov (!%p263_p2), 113  }
   0x9   : > { %s1674_s17 = smov (!%p263_p2), 112   ;;  %s1675_s20 = smov (!%p263_p2), 111  }
   0xb   : > { %s2094_s28 = smov (!%p296_p3, %s1573_s28), 1  ;;  %v1784_v26 = vld [vmem:[%s2085_s1] sm:$0x3]  ;;  %vm346_vm0 = vcmask 138240   ;;  %vm370_vm1 = vcmask 130048   ;;  %vm386_vm2 = vcmask 1043456  }
   0xc   : > { %s1638_s29 = sshll.u32 %s2094_s28, 3  ;;  %v352_v29 = vperm.slane %v1784_v26, 0  ;;  %v353_v30 = vperm.slane %v1784_v26, 1  ;;  %v1801_v39 = vld [vmem:[%s2085_s1 + $0x2] sm:$0x3]  ;;  %vm382_vm3 = vcmask 31744  }
   0xd   : > { %s300_s10 = scalar_lea.vmem %s2084_s0, %s1638_s29  ;;  %v315_v40 = vld [vmem:[%s2086_s2] sm:$0xff]  ;;  %v377_v41 = vperm.slane %v1801_v39, 1  ;;  %v376_v44 = vperm.slane %v1801_v39, 0  ;;  %v316_v45 = vld [vmem:[%s2086_s2 + $0x8] sm:$0xff]  ;;  %vm494_vm4 = vcmask 121856   ;;  %v317_v59 = vld [vmem:[%s2086_s2 + $0x10] sm:$0xff] }
   0xe   : > { %v1738_v0 = vld [vmem:[%s300_s10] sm:$0xff]  ;;  %vm569_vm5 = vcmask 7168   ;;  %vm691_vm6 = vcmask 1039360   ;;  %vm766_vm7 = vcmask 924672   ;;  %vm841_vm8 = vcmask 916480  }
   0xf   : > { %334 = vst [vmem:[#allocation1] ss:$2 sm:$0xff] %v1738_v0  ;;  %v1828_v49 = vld [vmem:[%s2085_s1 + $0x4] sm:$0x3]  ;;  %v1855_v61 = vld [vmem:[%s2085_s1 + $0x6] sm:$0x3] }
  0x10   : > { %v500_v50 = vperm.slane %v1828_v49, 0  ;;  %v501_v51 = vperm.slane %v1828_v49, 1  ;;  %v319_v60 = vld [vmem:[%s2086_s2 + $0x20] sm:$0xff]  ;;  %v575_v62 = vperm.slane %v1855_v61, 0  ;;  %v576_v63 = vperm.slane %v1855_v61, 1 }
  0x11   : > { %vm916_vm9 = vcmask 908288   ;;  %vm1026_vm10 = vcmask 64512   ;;  %v1502_v39 = vld [vmem:[%s2091_s7] sm:$0xf] }
  0x16   : > { %v335_v1 = vld.sshfl [vmem:[#allocation1 + $0x8] sm:$0xff pattern:$0x75316420] }
  0x17   : > { %336 = vrot.lane.b32.xlu0 %v335_v1, %s1668_s11  ;;  %339 = vst [vmem:[#allocation1] ss:$2 sm:$0xff] %v1738_v0 }
  0x1e   : > { %v341_v2 = vld.sshfl [vmem:[#allocation1 + $0x8] sm:$0xff pattern:$0x75316420]  ;;  %v340_v3 = vld.sshfl [vmem:[#allocation1] sm:$0xff pattern:$0x75316420] }
  0x1f   : > { %344 = vrot.lane.b32.xlu1 %v341_v2, %s1668_s11  ;;  %342 = vrot.lane.b32.xlu0 %v340_v3, %s1668_s11  ;;  %358 = vst [vmem:[#allocation1] ss:$2 sm:$0xff] %v1738_v0 }
  0x26   : > { %v359_v4 = vld.sshfl [vmem:[#allocation1 + $0x8] sm:$0xff pattern:$0x75316420] }
  0x27   : > { %360 = vrot.lane.b32.xlu1 %v359_v4, %s1669_s12  ;;  %363 = vst [vmem:[#allocation1] ss:$2 sm:$0xff] %v1738_v0 }
  0x2e   : > { %v364_v5 = vld.sshfl [vmem:[#allocation1] sm:$0xff pattern:$0x75316420]  ;;  %v365_v6 = vld.sshfl [vmem:[#allocation1 + $0x8] sm:$0xff pattern:$0x75316420] }
  0x2f   : > { %482 = vst [vmem:[#allocation1] ss:$2 sm:$0xff] %v1738_v0  ;;  %366 = vrot.lane.b32.xlu2 %v364_v5, %s1669_s12 }
  0x36   : > { %v483_v7 = vld.sshfl [vmem:[#allocation1 + $0x8] sm:$0xff pattern:$0x75316420] }
  0x37   : > { %484 = vrot.lane.b32.xlu0 %v483_v7, %s1670_s13  ;;  %487 = vst [vmem:[#allocation1] ss:$2 sm:$0xff] %v1738_v0  ;;  %368 = vrot.lane.b32.xlu2 %v365_v6, %s1669_s12  ;;  %v318_v7 = vld [vmem:[%s2086_s2 + $0x18] sm:$0xff] }
  0x3e   : > { %v488_v8 = vld.sshfl [vmem:[#allocation1] sm:$0xff pattern:$0x75316420]  ;;  %v489_v9 = vld.sshfl [vmem:[#allocation1 + $0x8] sm:$0xff pattern:$0x75316420] }
  0x3f   : > { %490 = vrot.lane.b32.xlu1 %v488_v8, %s1670_s13  ;;  %557 = vst [vmem:[#allocation1] ss:$2 sm:$0xff] %v1738_v0  ;;  %492 = vrot.lane.b32.xlu2 %v489_v9, %s1670_s13  ;;  %v1877_v8 = vld [vmem:[%s2085_s1 + $0xa] sm:$0x3] }
  0x40   : > { %v702_v9 = vperm.slane %v1877_v8, 0 }
  0x46   : > { %v558_v10 = vld.sshfl [vmem:[#allocation1 + $0x8] sm:$0xff pattern:$0x75316420] }
  0x47   : > { %559 = vrot.lane.b32.xlu0 %v558_v10, %s1671_s14  ;;  %562 = vst [vmem:[#allocation1] ss:$2 sm:$0xff] %v1738_v0  ;;  %v703_v10 = vperm.slane %v1877_v8, 1 }
  0x4e   : > { %v563_v11 = vld.sshfl [vmem:[#allocation1] sm:$0xff pattern:$0x75316420]  ;;  %v564_v12 = vld.sshfl [vmem:[#allocation1 + $0x8] sm:$0xff pattern:$0x75316420] }
  0x4f   : > { %565 = vrot.lane.b32.xlu1 %v563_v11, %s1671_s14  ;;  %632 = vst [vmem:[#allocation1] ss:$2 sm:$0xff] %v1738_v0  ;;  %567 = vrot.lane.b32.xlu2 %v564_v12, %s1671_s14 }
  0x56   : > { %v1761_v13 = vld.sshfl [vmem:[#allocation1] sm:$0xff pattern:$0x75316420]  ;;  %v1763_v14 = vld.sshfl [vmem:[#allocation1 + $0x8] sm:$0xff pattern:$0x75316420] }
  0x57   : > { %684 = vst [vmem:[#allocation1] ss:$2 sm:$0xff] %v1738_v0 }
  0x5e   : > { %v686_v15 = vld.sshfl [vmem:[#allocation1 + $0x8] sm:$0xff pattern:$0x75316420]  ;;  %v685_v16 = vld.sshfl [vmem:[#allocation1] sm:$0xff pattern:$0x75316420] }
  0x5f   : > { %689 = vrot.lane.b32.xlu1 %v686_v15, %s1672_s15  ;;  %687 = vrot.lane.b32.xlu0 %v685_v16, %s1672_s15  ;;  %695 = vst [vmem:[#allocation1] ss:$2 sm:$0xff] %v1738_v0 }
  0x66   : > { %v696_v17 = vld.sshfl [vmem:[#allocation1] sm:$0xff pattern:$0x75316420] }
  0x67   : > { %759 = vst [vmem:[#allocation1] ss:$2 sm:$0xff] %v1738_v0  ;;  %697 = vrot.lane.b32.xlu2 %v696_v17, %s1672_s15 }
  0x6e   : > { %v761_v18 = vld.sshfl [vmem:[#allocation1 + $0x8] sm:$0xff pattern:$0x75316420]  ;;  %v760_v19 = vld.sshfl [vmem:[#allocation1] sm:$0xff pattern:$0x75316420] }
  0x6f   : > { %764 = vrot.lane.b32.xlu1 %v761_v18, %s1673_s16  ;;  %762 = vrot.lane.b32.xlu0 %v760_v19, %s1673_s16  ;;  %770 = vst [vmem:[#allocation1] ss:$2 sm:$0xff] %v1738_v0  ;;  %v320_v18 = vld [vmem:[%s2086_s2 + $0x28] sm:$0xff] }
  0x70   : > { %v1897_v19 = vld [vmem:[%s2085_s1 + $0xc] sm:$0x3] }
  0x76   : > { %v771_v20 = vld.sshfl [vmem:[#allocation1] sm:$0xff pattern:$0x75316420] }
  0x77   : > { %834 = vst [vmem:[#allocation1] ss:$2 sm:$0xff] %v1738_v0  ;;  %772 = vrot.lane.b32.xlu2 %v771_v20, %s1673_s16  ;;  %v777_v20 = vperm.slane %v1897_v19, 0 }
  0x7e   : > { %v836_v21 = vld.sshfl [vmem:[#allocation1 + $0x8] sm:$0xff pattern:$0x75316420]  ;;  %v835_v22 = vld.sshfl [vmem:[#allocation1] sm:$0xff pattern:$0x75316420] }
  0x7f   : > { %839 = vrot.lane.b32.xlu1 %v836_v21, %s1674_s17  ;;  %837 = vrot.lane.b32.xlu0 %v835_v22, %s1674_s17  ;;  %845 = vst [vmem:[#allocation1] ss:$2 sm:$0xff] %v1738_v0  ;;  %v778_v21 = vperm.slane %v1897_v19, 1  ;;  %v328_v19 = vld [vmem:[%s2087_s3 + $0x10] sm:$0xf] }
  0x86   : > { %v846_v23 = vld.sshfl [vmem:[#allocation1] sm:$0xff pattern:$0x75316420] }
  0x87   : > { %909 = vst [vmem:[#allocation1] ss:$2 sm:$0xff] %v1738_v0  ;;  %847 = vrot.lane.b32.xlu2 %v846_v23, %s1674_s17 }
  0x89   : > { %v337_v24 = vpop.permute.xlu0 %336  ;;  %v367_v25 = vpop.permute.xlu2 %366 }
  0x8e   : > { %v911_v27 = vld.sshfl [vmem:[#allocation1 + $0x8] sm:$0xff pattern:$0x75316420]  ;;  %v910_v28 = vld.sshfl [vmem:[#allocation1] sm:$0xff pattern:$0x75316420] }
  0x8f   : > { %914 = vrot.lane.b32.xlu1 %v911_v27, %s1675_s20  ;;  %912 = vrot.lane.b32.xlu0 %v910_v28, %s1675_s20  ;;  %920 = vst [vmem:[#allocation1] ss:$2 sm:$0xff] %v1738_v0 }
  0x91   : > { %v345_v31 = vpop.permute.xlu1 %344  ;;  %v343_v32 = vpop.permute.xlu0 %342 }
  0x92   : > { %v347_v33 = vsel %vm346_vm0, %v343_v32, %v345_v31  ;;  %v350_v34 = vsel %vm346_vm0, %v337_v24, %v343_v32  ;;  %v369_v35 = vpop.permute.xlu2 %368  ;;  %v321_v32 = vld [vmem:[%s2086_s2 + $0x30] sm:$0xff] }
  0x93   : > { %v371_v36 = vsel %vm370_vm1, %v367_v25, %v369_v35  ;;  %v356_v37 = vmul.f32 %v352_v29, %v350_v34  ;;  %v357_v38 = vmul.f32 %v353_v30, %v347_v33  ;;  %v984_v33 = vld [vmem:[%s2088_s4] sm:$0xff]  ;;  %v1676_v35 = vmov 0  }
  0x94   : > { %v381_v43 = vmul.f32 %v377_v41, %v371_v36  ;;  %v992_v34 = vld [vmem:[%s2089_s5] sm:$0xff]  ;;  %1657 = vset.pattern.permute.xlu0 %v1676_v35  ;;  %1658 = vset.pattern.permute.xlu1 %v1676_v35  ;;  %v1923_v36 = vld [vmem:[%s2085_s1 + $0xe] sm:$0x3] }
  0x95   : > { %1586 = vmatpush.msk.msra.mxu2 %vm386_vm2, %v356_v37  ;;  %1588 = vmatpush.msk.msra.mxu3 %vm386_vm2, %v357_v38  ;;  %v852_v37 = vperm.slane %v1923_v36, 0  ;;  %v853_v38 = vperm.slane %v1923_v36, 1  ;;  %v332_v36 = vld [vmem:[%s2087_s3 + $0x20] sm:$0xf] }
  0x96   : > { %v921_v42 = vld.sshfl [vmem:[#allocation1] sm:$0xff pattern:$0x75316420]  ;;  %1587 = vmatmul.msk.f32.vlgmr.msra.gmra.mxu2 %vm382_vm3, %v315_v40  ;;  %1589 = vmatmul.msk.f32.vlgmr.msra.gmra.mxu3 %vm382_vm3, %v315_v40 }
  0x97   : > { %922 = vrot.lane.b32.xlu2 %v921_v42, %s1675_s20  ;;  %1584 = vmatpush.msk.msra.mxu1 %vm386_vm2, %v381_v43 }
  0x98   : > { %1585 = vmatmul.msk.f32.vlgmr.msra.gmra.mxu1 %vm382_vm3, %v316_v45  ;;  %987 = vperm.xlu0 %1657, %v984_v33  }
  0x99   : > { %v361_v46 = vpop.permute.xlu1 %360  ;;  %995 = vperm.xlu1 %1658, %v992_v34   ;;  %1659 = vset.pattern.permute.xlu2 %v1676_v35 }
  0x9a   : > { %v374_v47 = vsel %vm370_vm1, %v361_v46, %v367_v25  ;;  %v493_v52 = vpop.permute.xlu2 %492 }
  0x9b   : > { %v380_v48 = vmul.f32 %v376_v44, %v374_v47 }
  0x9d   : > { %1582 = vmatpush.msk.msra.mxu0 %vm386_vm2, %v380_v48 }
  0x9e   : > { %1583 = vmatmul.msk.f32.vlgmr.msra.gmra.mxu0 %vm382_vm3, %v316_v45 }
  0xa9   : > { %v485_v53 = vpop.permute.xlu0 %484  ;;  %v568_v0 = vpop.permute.xlu2 %567 }
  0xb1   : > { %v491_v54 = vpop.permute.xlu1 %490 }
  0xb2   : > { %v495_v55 = vsel %vm494_vm4, %v491_v54, %v493_v52  ;;  %v498_v56 = vsel %vm494_vm4, %v485_v53, %v491_v54  ;;  %v322_v52 = vld [vmem:[%s2086_s2 + $0x38] sm:$0xff]  ;;  %v1943_v53 = vld [vmem:[%s2085_s1 + $0x10] sm:$0x3] }
  0xb3   : > { %v504_v57 = vmul.f32 %v500_v50, %v498_v56  ;;  %v505_v58 = vmul.f32 %v501_v51, %v495_v55  ;;  %v927_v54 = vperm.slane %v1943_v53, 0  ;;  %v928_v55 = vperm.slane %v1943_v53, 1 }
  0xb5   : > { %1590 = vmatpush.msk.msrb.mxu0 %vm386_vm2, %v504_v57  ;;  %1592 = vmatpush.msk.msrb.mxu1 %vm386_vm2, %v505_v58 }
  0xb6   : > { %1591 = vmatmul.msk.f32.vlgmr.msrb.gmra.mxu0 %vm382_vm3, %v317_v59  ;;  %1593 = vmatmul.msk.f32.vlgmr.msrb.gmra.mxu1 %vm382_vm3, %v317_v59 }
  0xb7   : > { %1598 = vmatpush.msk.msra.mxu0 %vm386_vm2, %v1761_v13  ;;  %1600 = vmatpush.msk.msra.mxu1 %vm386_vm2, %v1763_v14 }
  0xb9   : > { %v560_v1 = vpop.permute.xlu0 %559 }
  0xbe   : > { %1599 = vmatmul.msk.f32.vlgmr.msra.gmra.mxu0 %vm382_vm3, %v319_v60  ;;  %1601 = vmatmul.msk.f32.vlgmr.msra.gmra.mxu1 %vm382_vm3, %v319_v60 }
  0xc1   : > { %v566_v2 = vpop.permute.xlu1 %565  ;;  %v698_v11 = vpop.permute.xlu2 %697 }
  0xc2   : > { %v570_v3 = vsel %vm569_vm5, %v566_v2, %v568_v0  ;;  %v573_v4 = vsel %vm569_vm5, %v560_v1, %v566_v2  ;;  %v323_v2 = vld [vmem:[%s2086_s2 + $0x40] sm:$0xff] }
  0xc3   : > { %v579_v5 = vmul.f32 %v575_v62, %v573_v4  ;;  %v580_v6 = vmul.f32 %v576_v63, %v570_v3 }
  0xc5   : > { %1594 = vmatpush.msk.msrb.mxu2 %vm386_vm2, %v579_v5  ;;  %1596 = vmatpush.msk.msrb.mxu3 %vm386_vm2, %v580_v6 }
  0xc6   : > { %1595 = vmatmul.msk.f32.vlgmr.msrb.gmra.mxu2 %vm382_vm3, %v318_v7  ;;  %1597 = vmatmul.msk.f32.vlgmr.msrb.gmra.mxu3 %vm382_vm3, %v318_v7 }
  0xd1   : > { %v690_v12 = vpop.permute.xlu1 %689  ;;  %v688_v13 = vpop.permute.xlu0 %687 }
  0xd2   : > { %v692_v14 = vsel %vm691_vm6, %v688_v13, %v690_v12  ;;  %v700_v15 = vsel %vm691_vm6, %v690_v12, %v698_v11  ;;  %v773_v22 = vpop.permute.xlu2 %772 }
  0xd3   : > { %v706_v16 = vmul.f32 %v702_v9, %v692_v14  ;;  %v707_v17 = vmul.f32 %v703_v10, %v700_v15 }
  0xd5   : > { %1602 = vmatpush.msk.msra.mxu2 %vm386_vm2, %v706_v16  ;;  %1604 = vmatpush.msk.msra.mxu3 %vm386_vm2, %v707_v17 }
  0xd6   : > { %1603 = vmatmul.msk.f32.vlgmr.msra.gmra.mxu2 %vm382_vm3, %v320_v18  ;;  %1605 = vmatmul.msk.f32.vlgmr.msra.gmra.mxu3 %vm382_vm3, %v320_v18 }
  0xe1   : > { %v765_v23 = vpop.permute.xlu1 %764  ;;  %v763_v24 = vpop.permute.xlu0 %762 }
  0xe2   : > { %v767_v25 = vsel %vm766_vm7, %v763_v24, %v765_v23  ;;  %v775_v27 = vsel %vm766_vm7, %v765_v23, %v773_v22  ;;  %v848_v40 = vpop.permute.xlu2 %847 }
  0xe3   : > { %v781_v28 = vmul.f32 %v777_v20, %v767_v25  ;;  %v782_v31 = vmul.f32 %v778_v21, %v775_v27 }
  0xe5   : > { %1606 = vmatpush.msk.msrb.mxu0 %vm386_vm2, %v781_v28  ;;  %1608 = vmatpush.msk.msrb.mxu1 %vm386_vm2, %v782_v31 }
  0xe6   : > { %1607 = vmatmul.msk.f32.vlgmr.msrb.gmra.mxu0 %vm382_vm3, %v321_v32  ;;  %1609 = vmatmul.msk.f32.vlgmr.msrb.gmra.mxu1 %vm382_vm3, %v321_v32 }
  0xf1   : > { %v840_v42 = vpop.permute.xlu1 %839  ;;  %v838_v43 = vpop.permute.xlu0 %837 }
  0xf2   : > { %v842_v45 = vsel %vm841_vm8, %v838_v43, %v840_v42  ;;  %v850_v46 = vsel %vm841_vm8, %v840_v42, %v848_v40  ;;  %v923_v56 = vpop.permute.xlu2 %922 }
  0xf3   : > { %v856_v47 = vmul.f32 %v852_v37, %v842_v45  ;;  %v857_v48 = vmul.f32 %v853_v38, %v850_v46 }
  0xf5   : > { %1610 = vmatpush.msk.msrb.mxu2 %vm386_vm2, %v856_v47  ;;  %1612 = vmatpush.msk.msrb.mxu3 %vm386_vm2, %v857_v48 }
  0xf6   : > { %1611 = vmatmul.msk.f32.vlgmr.msrb.gmra.mxu2 %vm382_vm3, %v322_v52  ;;  %1613 = vmatmul.msk.f32.vlgmr.msrb.gmra.mxu3 %vm382_vm3, %v322_v52 }
 0x101   : > { %v915_v57 = vpop.permute.xlu1 %914  ;;  %v913_v58 = vpop.permute.xlu0 %912 }
 0x102   : > { %v917_v59 = vsel %vm916_vm9, %v913_v58, %v915_v57  ;;  %v925_v60 = vsel %vm916_vm9, %v915_v57, %v923_v56 }
 0x103   : > { %v931_v0 = vmul.f32 %v927_v54, %v917_v59  ;;  %v932_v1 = vmul.f32 %v928_v55, %v925_v60 }
 0x105   : > { %1614 = vmatpush.msk.msra.mxu0 %vm386_vm2, %v931_v0  ;;  %1616 = vmatpush.msk.msra.mxu1 %vm386_vm2, %v932_v1 }
 0x106   : > { %1615 = vmatmul.msk.f32.vlgmr.msra.gmra.mxu0 %vm382_vm3, %v323_v2  ;;  %1617 = vmatmul.msk.f32.vlgmr.msra.gmra.mxu1 %vm382_vm3, %v323_v2 }
 0x10a   : > { %v988_v48 = vpop.permute.xlu0 %987 }
 0x10b   : > { %v996_v59 = vpop.permute.xlu1 %995 }
 0x115   : > { %v430_v4 = vpop.f32.mrf.mxu1 }
 0x119   : > { %v479_v5 = vpop.f32.mrf.mxu3  ;;  %v459_v6 = vpop.f32.mrf.mxu2 }
 0x11a   : > { %v480_v14 = vadd.f32 %v479_v5, %v430_v4  ;;  %v1494_v5 = vld [vmem:[%s2090_s6] sm:$0xf] }
 0x11b   : > { %v410_v3 = vpop.f32.mrf.mxu0 }
 0x11c   : > { %v460_v13 = vadd.f32 %v459_v6, %v410_v3 }
 0x133   : > { %v532_v7 = vpop.f32.mrf.mxu0  ;;  %v552_v11 = vpop.f32.mrf.mxu1 }
 0x134   : > { %v555_v16 = vadd.f32 %v532_v7, %v460_v13  ;;  %v556_v17 = vadd.f32 %v552_v11, %v480_v14 }
 0x13b   : > { %v659_v18 = vpop.f32.mrf.mxu0  ;;  %v679_v22 = vpop.f32.mrf.mxu1 }
 0x149   : > { %v627_v12 = vpop.f32.mrf.mxu3  ;;  %v607_v15 = vpop.f32.mrf.mxu2 }
 0x14a   : > { %v630_v23 = vadd.f32 %v607_v15, %v555_v16  ;;  %v631_v24 = vadd.f32 %v627_v12, %v556_v17 }
 0x14c   : > { %v682_v28 = vadd.f32 %v659_v18, %v630_v23  ;;  %v683_v31 = vadd.f32 %v679_v22, %v631_v24 }
 0x159   : > { %v754_v25 = vpop.f32.mrf.mxu3  ;;  %v734_v27 = vpop.f32.mrf.mxu2 }
 0x15a   : > { %v757_v34 = vadd.f32 %v734_v27, %v682_v28  ;;  %v758_v35 = vadd.f32 %v754_v25, %v683_v31  ;;  %v325_v25 = vld [vmem:[%s2087_s3 + $0x4] sm:$0xf]  ;;  %v324_v28 = vld [vmem:[%s2087_s3] sm:$0xf] }
 0x163   : > { %v809_v32 = vpop.f32.mrf.mxu0  ;;  %v829_v33 = vpop.f32.mrf.mxu1 }
 0x164   : > { %v832_v43 = vadd.f32 %v809_v32, %v757_v34  ;;  %v833_v45 = vadd.f32 %v829_v33, %v758_v35  ;;  %v326_v32 = vld [vmem:[%s2087_s3 + $0x8] sm:$0xf] }
 0x179   : > { %v884_v40 = vpop.f32.mrf.mxu2  ;;  %v904_v42 = vpop.f32.mrf.mxu3 }
 0x17a   : > { %v907_v46 = vadd.f32 %v884_v40, %v832_v43  ;;  %v908_v47 = vadd.f32 %v904_v42, %v833_v45 }
 0x183   : > { %v959_v52 = vpop.f32.mrf.mxu0  ;;  %v979_v56 = vpop.f32.mrf.mxu1 }
 0x184   : > { %v982_v57 = vadd.f32 %v959_v52, %v907_v46  ;;  %v983_v58 = vadd.f32 %v979_v56, %v908_v47  ;;  %v327_v46 = vld [vmem:[%s2087_s3 + $0xc] sm:$0xf]  ;;  %v329_v52 = vld [vmem:[%s2087_s3 + $0x14] sm:$0xf]  ;;  %v330_v56 = vld [vmem:[%s2087_s3 + $0x18] sm:$0xf] }
 0x186   : > { %v990_v60 = vmul.f32 %v988_v48, %v982_v57  ;;  %v991_v0 = vmul.f32 %v988_v48, %v983_v58 }
 0x188   : > { %v998_v1 = vadd.f32 %v996_v59, %v990_v60  ;;  %v999_v2 = vadd.f32 %v996_v59, %v991_v0 }
 0x18a   : > { %v1000_v3 = vmax.f32 %v998_v1, 0.0  ;;  %v1001_v4 = vmax.f32 %v999_v2, 0.0 }
 0x18c   : > { %1015 = vrot.lane.b32.xlu2 %v1001_v4, %s1669_s12  ;;  %1116 = vrot.lane.b32.xlu0 %v1000_v3, %s1670_s13 }
 0x18d   : > { %1018 = vrot.lane.b32.xlu1 %v1000_v3, %s1669_s12 }
 0x194   : > { %1113 = vrot.lane.b32.xlu2 %v1001_v4, %s1670_s13  ;;  %1169 = vrot.lane.b32.xlu0 %v1001_v4, %s1671_s14 }
 0x195   : > { %1003 = vrot.lane.b32.xlu1 %v1001_v4, %s1668_s11 }
 0x19c   : > { %1007 = vrot.lane.b32.xlu2 %v1000_v3, %s1668_s11  ;;  %1328 = vrot.lane.b32.xlu0 %v1001_v4, %s1673_s16 }
 0x19d   : > { %1172 = vrot.lane.b32.xlu1 %v1000_v3, %s1671_s14 }
 0x1a4   : > { %1326 = vrot.lane.b32.xlu2 %v1000_v3, %s1673_s16  ;;  %1438 = vrot.lane.b32.xlu0 %v1000_v3, %s1675_s20  ;;  %s305_s16 = scalar_lea.vmem %s2092_s8, %s1638_s29 }
 0x1a5   : > { %1270 = vrot.lane.b32.xlu1 %v1000_v3, %s1672_s15 }
 0x1ac   : > { %1272 = vrot.lane.b32.xlu2 %v1001_v4, %s1672_s15  ;;  %1384 = vrot.lane.b32.xlu0 %v1001_v4, %s1674_s17 }
 0x1ad   : > { %1440 = vrot.lane.b32.xlu1 %v1001_v4, %s1675_s20 }
 0x1b4   : > { %1382 = vrot.lane.b32.xlu2 %v1000_v3, %s1674_s17 }
 0x1b5   : > { %1497 = vperm.xlu1 %1658, %v1494_v5  }
 0x1bc   : > { %1505 = vperm.xlu2 %1659, %v1502_v39  }
 0x1e6   : > { %v1016_v6 = vpop.permute.xlu2 %1015 }
 0x1ee   : > { %v1114_v7 = vpop.permute.xlu2 %1113 }
 0x1f6   : > { %v1008_v15 = vpop.permute.xlu2 %1007 }
 0x1fe   : > { %v1117_v11 = vpop.permute.xlu0 %1116  ;;  %v1327_v31 = vpop.permute.xlu2 %1326 }
 0x1ff   : > { %v1118_v12 = vsel %vm494_vm4, %v1117_v11, %v1114_v7  ;;  %v1121_v13 = vsel %vm494_vm4, %v1114_v7, %v1117_v11  ;;  %v1019_v14 = vpop.permute.xlu1 %1018 }
 0x200   : > { %v1020_v16 = vsel %vm370_vm1, %v1019_v14, %v1016_v6  ;;  %v1023_v17 = vsel %vm370_vm1, %v1016_v6, %v1019_v14  ;;  %v1122_v18 = vmul.f32 %v1121_v13, %v500_v50  ;;  %v1123_v22 = vmul.f32 %v1118_v12, %v501_v51 }
 0x201   : > { %v1024_v23 = vmul.f32 %v1023_v17, %v376_v44  ;;  %v1025_v24 = vmul.f32 %v1020_v16, %v377_v41 }
 0x203   : > { %1045 = vmatpush.msra.mxu2 %v1024_v23  ;;  %1065 = vmatpush.msra.mxu3 %v1025_v24 }
 0x204   : > { %1618 = vmatmul.msk.f32.vlgmr.msra.gmra.mxu2 %vm1026_vm10, %v325_v25  ;;  %1619 = vmatmul.msk.f32.vlgmr.msra.gmra.mxu3 %vm1026_vm10, %v325_v25 }
 0x205   : > { %1142 = vmatpush.msrb.mxu2 %v1122_v18  ;;  %1162 = vmatpush.msrb.mxu3 %v1123_v22 }
 0x206   : > { %v1170_v49 = vpop.permute.xlu0 %1169 }
 0x207   : > { %1243 = vmatpush.msra.mxu2 %v1000_v3  ;;  %1263 = vmatpush.msra.mxu3 %v1001_v4  ;;  %v1004_v50 = vpop.permute.xlu1 %1003  ;;  %v331_v4 = vld [vmem:[%s2087_s3 + $0x1c] sm:$0xf] }
 0x208   : > { %v1009_v41 = vsel %vm346_vm0, %v1008_v15, %v1004_v50  ;;  %v1012_v44 = vsel %vm346_vm0, %v1004_v50, %v1008_v15 }
 0x209   : > { %v1013_v51 = vmul.f32 %v1012_v44, %v352_v29  ;;  %v1014_v27 = vmul.f32 %v1009_v41, %v353_v30 }
 0x20b   : > { %1088 = vmatpush.msrb.mxu0 %v1013_v51  ;;  %1108 = vmatpush.msrb.mxu1 %v1014_v27 }
 0x20c   : > { %1620 = vmatmul.msk.f32.vlgmr.msrb.gmra.mxu0 %vm1026_vm10, %v324_v28  ;;  %1621 = vmatmul.msk.f32.vlgmr.msrb.gmra.mxu1 %vm1026_vm10, %v324_v28 }
 0x20d   : > { %1622 = vmatmul.msk.f32.vlgmr.msrb.gmra.mxu2 %vm1026_vm10, %v326_v32  ;;  %1623 = vmatmul.msk.f32.vlgmr.msrb.gmra.mxu3 %vm1026_vm10, %v326_v32 }
 0x20e   : > { %v1329_v26 = vpop.permute.xlu0 %1328 }
 0x20f   : > { %v1330_v29 = vsel %vm766_vm7, %v1327_v31, %v1329_v26  ;;  %v1334_v30 = vsel %vm766_vm7, %v1329_v26, %v1327_v31  ;;  %v1173_v33 = vpop.permute.xlu1 %1172 }
 0x210   : > { %v1335_v34 = vmul.f32 %v1330_v29, %v777_v20  ;;  %v1336_v35 = vmul.f32 %v1334_v30, %v778_v21  ;;  %v1174_v40 = vsel %vm569_vm5, %v1173_v33, %v1170_v49  ;;  %v1177_v42 = vsel %vm569_vm5, %v1170_v49, %v1173_v33  ;;  %v1273_v20 = vpop.permute.xlu2 %1272 }
 0x211   : > { %v1178_v43 = vmul.f32 %v1177_v42, %v575_v62  ;;  %v1179_v45 = vmul.f32 %v1174_v40, %v576_v63 }
 0x212   : > { %1355 = vmatpush.msrb.mxu2 %v1335_v34  ;;  %1375 = vmatpush.msrb.mxu3 %v1336_v35 }
 0x213   : > { %1198 = vmatpush.msra.mxu0 %v1178_v43  ;;  %1218 = vmatpush.msra.mxu1 %v1179_v45 }
 0x214   : > { %1624 = vmatmul.msk.f32.vlgmr.msra.gmra.mxu0 %vm1026_vm10, %v327_v46  ;;  %1625 = vmatmul.msk.f32.vlgmr.msra.gmra.mxu1 %vm1026_vm10, %v327_v46 }
 0x215   : > { %1626 = vmatmul.msk.f32.vlgmr.msra.gmra.mxu2 %vm1026_vm10, %v328_v19  ;;  %1627 = vmatmul.msk.f32.vlgmr.msra.gmra.mxu3 %vm1026_vm10, %v328_v19 }
 0x216   : > { %v1439_v61 = vpop.permute.xlu0 %1438 }
 0x217   : > { %v1271_v62 = vpop.permute.xlu1 %1270 }
 0x218   : > { %v1274_v63 = vsel %vm691_vm6, %v1271_v62, %v1273_v20  ;;  %v1278_v21 = vsel %vm691_vm6, %v1273_v20, %v1271_v62  ;;  %v1383_v8 = vpop.permute.xlu2 %1382 }
 0x219   : > { %v1279_v47 = vmul.f32 %v1274_v63, %v702_v9  ;;  %v1280_v48 = vmul.f32 %v1278_v21, %v703_v10 }
 0x21b   : > { %1299 = vmatpush.msrb.mxu0 %v1279_v47  ;;  %1319 = vmatpush.msrb.mxu1 %v1280_v48 }
 0x21c   : > { %1628 = vmatmul.msk.f32.vlgmr.msrb.gmra.mxu0 %vm1026_vm10, %v329_v52  ;;  %1629 = vmatmul.msk.f32.vlgmr.msrb.gmra.mxu1 %vm1026_vm10, %v329_v52 }
 0x21d   : > { %1630 = vmatmul.msk.f32.vlgmr.msrb.gmra.mxu2 %vm1026_vm10, %v330_v56  ;;  %1631 = vmatmul.msk.f32.vlgmr.msrb.gmra.mxu3 %vm1026_vm10, %v330_v56 }
 0x21e   : > { %v1385_v9 = vpop.permute.xlu0 %1384 }
 0x21f   : > { %v1386_v10 = vsel %vm841_vm8, %v1383_v8, %v1385_v9  ;;  %v1390_v57 = vsel %vm841_vm8, %v1385_v9, %v1383_v8  ;;  %v1441_v58 = vpop.permute.xlu1 %1440 }
 0x220   : > { %v1391_v59 = vmul.f32 %v1386_v10, %v852_v37  ;;  %v1392_v60 = vmul.f32 %v1390_v57, %v853_v38  ;;  %v1442_v0 = vsel %vm916_vm9, %v1439_v61, %v1441_v58  ;;  %v1446_v1 = vsel %vm916_vm9, %v1441_v58, %v1439_v61  ;;  %v1506_v35 = vpop.permute.xlu2 %1505 }
 0x221   : > { %v1447_v2 = vmul.f32 %v1442_v0, %v927_v54  ;;  %v1448_v3 = vmul.f32 %v1446_v1, %v928_v55 }
 0x222   : > { %1411 = vmatpush.msra.mxu0 %v1391_v59  ;;  %1431 = vmatpush.msra.mxu1 %v1392_v60 }
 0x223   : > { %1467 = vmatpush.msra.mxu2 %v1447_v2  ;;  %1487 = vmatpush.msra.mxu3 %v1448_v3 }
 0x224   : > { %1632 = vmatmul.msk.f32.vlgmr.msra.gmra.mxu0 %vm1026_vm10, %v331_v4  ;;  %1633 = vmatmul.msk.f32.vlgmr.msra.gmra.mxu1 %vm1026_vm10, %v331_v4 }
 0x225   : > { %1634 = vmatmul.msk.f32.vlgmr.msra.gmra.mxu2 %vm1026_vm10, %v332_v36  ;;  %1635 = vmatmul.msk.f32.vlgmr.msra.gmra.mxu3 %vm1026_vm10, %v332_v36 }
 0x227   : > { %v1498_v34 = vpop.permute.xlu1 %1497 }
 0x287   : > { %v1047_v37 = vpop.f32.mrf.mxu2  ;;  %v1067_v38 = vpop.f32.mrf.mxu3 }
 0x289   : > { %v1090_v53 = vpop.f32.mrf.mxu0  ;;  %v1110_v54 = vpop.f32.mrf.mxu1 }
 0x28a   : > { %v1091_v11 = vadd.f32 %v1090_v53, %v1047_v37  ;;  %v1111_v12 = vadd.f32 %v1110_v54, %v1067_v38 }
 0x290   : > { %v1144_v55 = vpop.f32.mrf.mxu2  ;;  %v1164_v5 = vpop.f32.mrf.mxu3 }
 0x291   : > { %v1200_v6 = vpop.f32.mrf.mxu0  ;;  %v1220_v7 = vpop.f32.mrf.mxu1  ;;  %v1167_v13 = vadd.f32 %v1144_v55, %v1091_v11  ;;  %v1168_v14 = vadd.f32 %v1164_v5, %v1111_v12 }
 0x293   : > { %v1223_v22 = vadd.f32 %v1200_v6, %v1167_v13  ;;  %v1224_v23 = vadd.f32 %v1220_v7, %v1168_v14 }
 0x298   : > { %v1245_v15 = vpop.f32.mrf.mxu2  ;;  %v1265_v16 = vpop.f32.mrf.mxu3 }
 0x299   : > { %v1301_v17 = vpop.f32.mrf.mxu0  ;;  %v1321_v18 = vpop.f32.mrf.mxu1  ;;  %v1268_v24 = vadd.f32 %v1245_v15, %v1223_v22  ;;  %v1269_v25 = vadd.f32 %v1265_v16, %v1224_v23 }
 0x29b   : > { %v1324_v39 = vadd.f32 %v1301_v17, %v1268_v24  ;;  %v1325_v41 = vadd.f32 %v1321_v18, %v1269_v25 }
 0x2a0   : > { %v1357_v49 = vpop.f32.mrf.mxu2  ;;  %v1377_v50 = vpop.f32.mrf.mxu3 }
 0x2a1   : > { %v1380_v44 = vadd.f32 %v1357_v49, %v1324_v39  ;;  %v1381_v51 = vadd.f32 %v1377_v50, %v1325_v41  ;;  %v1413_v27 = vpop.f32.mrf.mxu0  ;;  %v1433_v28 = vpop.f32.mrf.mxu1 }
 0x2a3   : > { %v1436_v31 = vadd.f32 %v1413_v27, %v1380_v44  ;;  %v1437_v32 = vadd.f32 %v1433_v28, %v1381_v51 }
 0x2a8   : > { %v1469_v26 = vpop.f32.mrf.mxu2  ;;  %v1489_v29 = vpop.f32.mrf.mxu3 }
 0x2a9   : > { %v1492_v30 = vadd.f32 %v1469_v26, %v1436_v31  ;;  %v1493_v33 = vadd.f32 %v1489_v29, %v1437_v32 }
 0x2ab   : > { %v1500_v40 = vmul.f32 %v1498_v34, %v1492_v30  ;;  %v1501_v42 = vmul.f32 %v1498_v34, %v1493_v33 }
 0x2ad   : > { %v1508_v43 = vadd.f32 %v1506_v35, %v1500_v40  ;;  %v1509_v45 = vadd.f32 %v1506_v35, %v1501_v42 }
 0x2af   : > { %v1511_v46 = vmax.f32 %v1509_v45, 0.0  ;;  %v1510_v19 = vmax.f32 %v1508_v43, 0.0 }
 0x2b1   : > { %v1514_v20 = vrot.slane %v1511_v46, 4 }
 0x2b3   : > { %v1515_v61 = vsel %vm386_vm2, %v1510_v19, %v1514_v20 }
 0x2b4   : > { %1517 = vst [vmem:[%s305_s16] sm:$0xff] %v1515_v61 }
 0x2b5 PF: > { %s18_s27 = sadd.s32 1, %s1666_s27  }
 0x2b6   : > { %p15_p4 = scmp.ge.s32.totalorder %s18_s27, 4  }
 0x2b8   :  { %17 = sbr.rel (!%p15_p4) target bundleno = 1 (0x1), region = 82 }

</bundles_post_ra>
